<compile_context>
chip_gen: v6e
topology: v6e:2x2x1
jax: 0.10.0
libtpu: 0.0.40
codegen_flags: <defaults>
</compile_context>

<pallas_src>
import functools
import math

import jax
import jax.numpy as jnp
from jax import lax
from jax.experimental import pallas as pl
from jax.experimental.pallas import tpu as pltpu


def _round_up(x, m):
    return ((x + m - 1) // m) * m


def _nbytes(a):
    return a.size * jnp.dtype(a.dtype).itemsize


def _layer_norm_rows(y, gamma, beta, d_model, eps):
    """Row-wise LayerNorm over the (possibly padded) last dim.

    Statistics use the real `d_model` columns only; callers guarantee that
    padded columns of `y` are exactly zero, so the row sum already equals the
    real-column sum and only the variance needs an explicit column mask.
    """
    inv_d = 1.0 / float(d_model)
    mean = jnp.sum(y, axis=-1, keepdims=True) * inv_d
    centered = y - mean
    if y.shape[-1] != d_model:                      # mask padded cols out of var
        col = lax.broadcasted_iota(jnp.int32, y.shape, 1)
        centered = jnp.where(col < d_model, centered, 0.0)
    var = jnp.sum(centered * centered, axis=-1, keepdims=True) * inv_d
    inv = lax.rsqrt(var + eps)
    return (y - mean) * inv * gamma + beta


def _swish_glu_ln_kernel(d_model, eps, x_ref, g_ref, wg_ref, bg_ref,
                         wo_ref, bo_ref, gamma_ref, beta_ref, o_ref):
    """One (TM, D) token tile of LN( Wo @ swish((Wg @ x + bg) * g) + bo + x )."""
    # PyTorch nn.Linear stores W as (out, in); contract the last dims directly
    # so the MXU consumes the native layout (no wrapper transpose needed).
    dn = (((1,), (1,)), ((), ()))
    x = x_ref[...]
    z = lax.dot_general(x, wg_ref[...], dn, preferred_element_type=jnp.float32)
    z = (z + bg_ref[...]) * g_ref[...]              # gate stays f32 (VPU)
    s = z * jax.nn.sigmoid(z)                       # swish in f32 (EUP sigmoid)
    y = lax.dot_general(s.astype(wo_ref.dtype), wo_ref[...], dn,
                        preferred_element_type=jnp.float32)
    y = y + bo_ref[...] + x.astype(jnp.float32)     # residual (out + inputs)
    o_ref[...] = _layer_norm_rows(y, gamma_ref[...], beta_ref[...],
                                  d_model, eps).astype(o_ref.dtype)


def _ffn_ln_kernel(d_model, eps, x_ref, w1_ref, b1_ref, w2_ref, b2_ref,
                   gamma_ref, beta_ref, o_ref):
    """One (TM, D) token tile of LN( W2 @ relu(W1 @ x + b1) + b2 + x )."""
    dn = (((1,), (1,)), ((), ()))
    x = x_ref[...]
    h = lax.dot_general(x, w1_ref[...], dn, preferred_element_type=jnp.float32)
    h = jnp.maximum(h + b1_ref[...], 0.0)           # ReLU in f32 (VPU)
    y = lax.dot_general(h.astype(w2_ref.dtype), w2_ref[...], dn,
                        preferred_element_type=jnp.float32)
    y = y + b2_ref[...] + x.astype(jnp.float32)     # residual (out + inputs)
    o_ref[...] = _layer_norm_rows(y, gamma_ref[...], beta_ref[...],
                                  d_model, eps).astype(o_ref.dtype)


def swish_layernorm_block(inputs, gate, wg, bg, wo, bo, gamma, beta, *,
                          eps=1e-5, matmul_dtype=jnp.bfloat16, block_tokens=512):
    """Fused `layer_norm(Swish(inputs, gate) + inputs)`.

    inputs, gate : (..., d_model)
    wg, wo       : (d_model, d_model)   nn.Linear weight layout (out, in)
    bg, bo       : (d_model,)
    gamma, beta  : (d_model,)           LayerNorm affine params
    """
    orig_shape = inputs.shape
    d = orig_shape[-1]
    if gate.shape != orig_shape:
        # Only materialize a broadcast if the shapes actually differ.
        gate = jnp.broadcast_to(gate, orig_shape)

    x2 = inputs.reshape(-1, d)
    g2 = gate.reshape(-1, d).astype(jnp.float32)
    t = x2.shape[0]

    # Lane-dense padding: last dim multiple of 128, token dim multiple of the
    # tile (and of 8) so every output store is an unmasked full-lane vst.
    d_pad = _round_up(max(d, 128), 128)
    tm = min(_round_up(block_tokens, 8), _round_up(t, 8))
    t_pad = _round_up(t, tm)

    if t_pad != t or d_pad != d:
        x2 = jnp.pad(x2, ((0, t_pad - t), (0, d_pad - d)))
        g2 = jnp.pad(g2, ((0, t_pad - t), (0, d_pad - d)))
    if d_pad != d:
        wg = jnp.pad(wg, ((0, d_pad - d), (0, d_pad - d)))
        wo = jnp.pad(wo, ((0, d_pad - d), (0, d_pad - d)))
        bg = jnp.pad(bg, (0, d_pad - d))
        bo = jnp.pad(bo, (0, d_pad - d))
        gamma = jnp.pad(gamma, (0, d_pad - d))
        beta = jnp.pad(beta, (0, d_pad - d))

    x_mm = x2.astype(matmul_dtype)
    wg_mm = wg.astype(matmul_dtype)
    wo_mm = wo.astype(matmul_dtype)
    bg2 = bg.reshape(1, d_pad).astype(jnp.float32)
    bo2 = bo.reshape(1, d_pad).astype(jnp.float32)
    gm2 = gamma.reshape(1, d_pad).astype(jnp.float32)
    bt2 = beta.reshape(1, d_pad).astype(jnp.float32)

    grid = (t_pad // tm,)

    # VMEM budget: resident weights/params + double-buffered (x, gate, out)
    # tiles, 2x headroom, capped at 64 MiB so the plan also fits v7x.
    resident = (_nbytes(wg_mm) + _nbytes(wo_mm)
                + _nbytes(bg2) + _nbytes(bo2) + _nbytes(gm2) + _nbytes(bt2))
    per_tile = tm * d_pad * (jnp.dtype(matmul_dtype).itemsize + 4
                             + jnp.dtype(inputs.dtype).itemsize)
    vmem_budget = int(min(max(2 * (resident + 2 * per_tile) + (2 << 20),
                              16 << 20), 64 << 20))

    bytes_accessed = (_nbytes(x_mm) + _nbytes(g2) + resident
                      + t_pad * d_pad * jnp.dtype(inputs.dtype).itemsize)
    cost = pl.CostEstimate(flops=4 * t_pad * d_pad * d_pad,
                           transcendentals=t_pad * d_pad,
                           bytes_accessed=int(bytes_accessed))

    kernel = functools.partial(_swish_glu_ln_kernel, d, eps)
    y = pl.pallas_call(
        kernel,
        out_shape=jax.ShapeDtypeStruct((t_pad, d_pad), inputs.dtype),
        grid=grid,
        in_specs=[
            pl.BlockSpec((tm, d_pad), lambda i: (i, 0)),      # x tile
            pl.BlockSpec((tm, d_pad), lambda i: (i, 0)),      # gate tile
            pl.BlockSpec((d_pad, d_pad), lambda i: (0, 0)),   # Wg (resident)
            pl.BlockSpec((1, d_pad), lambda i: (0, 0)),       # bg
            pl.BlockSpec((d_pad, d_pad), lambda i: (0, 0)),   # Wo (resident)
            pl.BlockSpec((1, d_pad), lambda i: (0, 0)),       # bo
            pl.BlockSpec((1, d_pad), lambda i: (0, 0)),       # LN gamma
            pl.BlockSpec((1, d_pad), lambda i: (0, 0)),       # LN beta
        ],
        out_specs=pl.BlockSpec((tm, d_pad), lambda i: (i, 0)),
        compiler_params=pltpu.CompilerParams(
            dimension_semantics=("parallel",),    # shard tiles over v7x's 2 TCs
            vmem_limit_bytes=vmem_budget),
        cost_estimate=cost,
    )(x_mm, g2, wg_mm, bg2, wo_mm, bo2, gm2, bt2)

    if t_pad != t or d_pad != d:
        y = y[:t, :d]
    return y.reshape(orig_shape)


def feed_forward_block(inputs, w1, b1, w2, b2, gamma, beta, *,
                       eps=1e-5, matmul_dtype=jnp.bfloat16, block_tokens=512):
    """Fused FeedForward.forward: layer_norm(linear2(relu(linear1(x))) + x).

    inputs      : (..., d_model)
    w1, b1      : (d_hidden_ff, d_model), (d_hidden_ff,)
    w2, b2      : (d_model, d_hidden_ff), (d_model,)
    gamma, beta : (d_model,)
    """
    orig_shape = inputs.shape
    d = orig_shape[-1]
    h = w1.shape[0]

    x2 = inputs.reshape(-1, d)
    t = x2.shape[0]

    d_pad = _round_up(max(d, 128), 128)
    h_pad = _round_up(max(h, 128), 128)
    tm = min(_round_up(block_tokens, 8), _round_up(t, 8))
    t_pad = _round_up(t, tm)

    if t_pad != t or d_pad != d:
        x2 = jnp.pad(x2, ((0, t_pad - t), (0, d_pad - d)))
    if d_pad != d or h_pad != h:
        w1 = jnp.pad(w1, ((0, h_pad - h), (0, d_pad - d)))
        w2 = jnp.pad(w2, ((0, d_pad - d), (0, h_pad - h)))
        b1 = jnp.pad(b1, (0, h_pad - h))
        b2 = jnp.pad(b2, (0, d_pad - d))
        gamma = jnp.pad(gamma, (0, d_pad - d))
        beta = jnp.pad(beta, (0, d_pad - d))

    x_mm = x2.astype(matmul_dtype)
    w1_mm = w1.astype(matmul_dtype)
    w2_mm = w2.astype(matmul_dtype)
    b1_2 = b1.reshape(1, h_pad).astype(jnp.float32)
    b2_2 = b2.reshape(1, d_pad).astype(jnp.float32)
    gm2 = gamma.reshape(1, d_pad).astype(jnp.float32)
    bt2 = beta.reshape(1, d_pad).astype(jnp.float32)

    grid = (t_pad // tm,)

    resident = (_nbytes(w1_mm) + _nbytes(w2_mm)
                + _nbytes(b1_2) + _nbytes(b2_2) + _nbytes(gm2) + _nbytes(bt2))
    per_tile = (tm * d_pad * (jnp.dtype(matmul_dtype).itemsize
                              + jnp.dtype(inputs.dtype).itemsize)
                + tm * h_pad * 4)                  # f32 hidden activation
    vmem_budget = int(min(max(2 * (resident + 2 * per_tile) + (2 << 20),
                              16 << 20), 64 << 20))

    bytes_accessed = (_nbytes(x_mm) + resident
                      + t_pad * d_pad * jnp.dtype(inputs.dtype).itemsize)
    cost = pl.CostEstimate(flops=4 * t_pad * d_pad * h_pad,
                           transcendentals=0,
                           bytes_accessed=int(bytes_accessed))

    kernel = functools.partial(_ffn_ln_kernel, d, eps)
    y = pl.pallas_call(
        kernel,
        out_shape=jax.ShapeDtypeStruct((t_pad, d_pad), inputs.dtype),
        grid=grid,
        in_specs=[
            pl.BlockSpec((tm, d_pad), lambda i: (i, 0)),      # x tile
            pl.BlockSpec((h_pad, d_pad), lambda i: (0, 0)),   # W1 (resident)
            pl.BlockSpec((1, h_pad), lambda i: (0, 0)),       # b1
            pl.BlockSpec((d_pad, h_pad), lambda i: (0, 0)),   # W2 (resident)
            pl.BlockSpec((1, d_pad), lambda i: (0, 0)),       # b2
            pl.BlockSpec((1, d_pad), lambda i: (0, 0)),       # LN gamma
            pl.BlockSpec((1, d_pad), lambda i: (0, 0)),       # LN beta
        ],
        out_specs=pl.BlockSpec((tm, d_pad), lambda i: (i, 0)),
        compiler_params=pltpu.CompilerParams(
            dimension_semantics=("parallel",),
            vmem_limit_bytes=vmem_budget),
        cost_estimate=cost,
    )(x_mm, w1_mm, b1_2, w2_mm, b2_2, gm2, bt2)

    if t_pad != t or d_pad != d:
        y = y[:t, :d]
    return y.reshape(orig_shape)


# ----------------------------- pure-JAX references -------------------------

def _layer_norm_ref(x, gamma, beta, eps=1e-5):
    m = jnp.mean(x, axis=-1, keepdims=True)
    v = jnp.mean((x - m) ** 2, axis=-1, keepdims=True)
    return (x - m) * lax.rsqrt(v + eps) * gamma + beta


def _swish_ln_ref(inputs, gate, wg, bg, wo, bo, gamma, beta):
    z = jnp.einsum("...i,oi->...o", inputs, wg) + bg
    z = z * gate
    s = z * jax.nn.sigmoid(z)
    y = jnp.einsum("...i,oi->...o", s, wo) + bo
    return _layer_norm_ref(y + inputs, gamma, beta)


def _ffn_ref(inputs, w1, b1, w2, b2, gamma, beta):
    hdn = jnp.maximum(jnp.einsum("...i,oi->...o", inputs, w1) + b1, 0.0)
    y = jnp.einsum("...i,oi->...o", hdn, w2) + b2
    return _layer_norm_ref(y + inputs, gamma, beta)


if __name__ == "__main__":
    key = jax.random.PRNGKey(0)
    B, P, N, D, DFF = 2, 4, 8, 32, 64   # batch, time, nodes, d_model, d_hidden_ff
    ks = jax.random.split(key, 18)

    inputs = jax.random.normal(ks[0], (B, P, N, D), dtype=jnp.float32)
    gate = jax.random.normal(ks[1], (B, P, N, D), dtype=jnp.float32)  # attn out

    # Swish params (nn.Linear(d_model, d_model) layout) + LayerNorm affine.
    bd = 1.0 / math.sqrt(D)
    wg = jax.random.uniform(ks[2], (D, D), minval=-bd, maxval=bd, dtype=jnp.float32)
    bg = jax.random.uniform(ks[3], (D,), minval=-bd, maxval=bd, dtype=jnp.float32)
    wo = jax.random.uniform(ks[4], (D, D), minval=-bd, maxval=bd, dtype=jnp.float32)
    bo = jax.random.uniform(ks[5], (D,), minval=-bd, maxval=bd, dtype=jnp.float32)
    gamma1 = 1.0 + 0.1 * jax.random.normal(ks[6], (D,), dtype=jnp.float32)
    beta1 = 0.1 * jax.random.normal(ks[7], (D,), dtype=jnp.float32)

    # FeedForward params.
    w1 = jax.random.uniform(ks[8], (DFF, D), minval=-bd, maxval=bd, dtype=jnp.float32)
    b1 = jax.random.uniform(ks[9], (DFF,), minval=-bd, maxval=bd, dtype=jnp.float32)
    bh = 1.0 / math.sqrt(DFF)
    w2 = jax.random.uniform(ks[10], (D, DFF), minval=-bh, maxval=bh, dtype=jnp.float32)
    b2 = jax.random.uniform(ks[11], (D,), minval=-bh, maxval=bh, dtype=jnp.float32)
    gamma2 = 1.0 + 0.1 * jax.random.normal(ks[12], (D,), dtype=jnp.float32)
    beta2 = 0.1 * jax.random.normal(ks[13], (D,), dtype=jnp.float32)

    # --- 1) fused Swish + residual + LayerNorm: bit-accurate f32 MXU path ---
    y_ref = _swish_ln_ref(inputs, gate, wg, bg, wo, bo, gamma1, beta1)
    y_f32 = swish_layernorm_block(inputs, gate, wg, bg, wo, bo, gamma1, beta1,
                                  matmul_dtype=jnp.float32)
    jax.block_until_ready(y_f32)
    assert y_f32.shape == (B, P, N, D)
    assert jnp.allclose(y_f32, y_ref, atol=1e-4, rtol=1e-4), "swish+LN f32 mismatch"

    # --- 2) recommended v6e/v7x path: bf16 MXU operands, f32 elementwise ---
    y_bf16 = swish_layernorm_block(inputs, gate, wg, bg, wo, bo, gamma1, beta1,
                                   matmul_dtype=jnp.bfloat16)
    jax.block_until_ready(y_bf16)
    assert jnp.allclose(y_bf16, y_ref, atol=5e-2, rtol=5e-2), "swish+LN bf16 mismatch"

    # --- 3) fused FeedForward + residual + LayerNorm ---
    ffn_ref = _ffn_ref(y_ref, w1, b1, w2, b2, gamma2, beta2)
    ffn_out = feed_forward_block(y_ref, w1, b1, w2, b2, gamma2, beta2,
                                 matmul_dtype=jnp.float32)
    jax.block_until_ready(ffn_out)
    assert ffn_out.shape == (B, P, N, D)
    assert jnp.allclose(ffn_out, ffn_ref, atol=1e-4, rtol=1e-4), "FFN+LN mismatch"

    # --- 4) multi-tile grid (token tiling + remainder padding) correctness ---
    N2 = 34                       # T = 2*4*34 = 272 tokens -> 3 tiles at tm=128
    inputs2 = jax.random.normal(ks[14], (B, P, N2, D), dtype=jnp.float32)
    gate2 = jax.random.normal(ks[15], (B, P, N2, D), dtype=jnp.float32)
    y2 = swish_layernorm_block(inputs2, gate2, wg, bg, wo, bo, gamma1, beta1,
                               matmul_dtype=jnp.float32, block_tokens=128)
    jax.block_until_ready(y2)
    y2_ref = _swish_ln_ref(inputs2, gate2, wg, bg, wo, bo, gamma1, beta1)
    assert jnp.allclose(y2, y2_ref, atol=1e-4, rtol=1e-4), "tiled mismatch"

    ffn2 = feed_forward_block(y2_ref, w1, b1, w2, b2, gamma2, beta2,
                              matmul_dtype=jnp.float32, block_tokens=128)
    jax.block_until_ready(ffn2)
    ffn2_ref = _ffn_ref(y2_ref, w1, b1, w2, b2, gamma2, beta2)
    assert jnp.allclose(ffn2, ffn2_ref, atol=1e-4, rtol=1e-4), "tiled FFN mismatch"

    print("KERNEL_OK")
</pallas_src>

<mosaic_0001>
module attributes {stable_mosaic.version = 11 : i64} {
  func.func @_swish_glu_ln_kernel(%arg0: i32, %arg1: memref<64x128xf32, #tpu.memory_space<vmem>>, %arg2: memref<64x128xf32, #tpu.memory_space<vmem>>, %arg3: memref<128x128xf32, #tpu.memory_space<vmem>>, %arg4: memref<1x128xf32, #tpu.memory_space<vmem>>, %arg5: memref<128x128xf32, #tpu.memory_space<vmem>>, %arg6: memref<1x128xf32, #tpu.memory_space<vmem>>, %arg7: memref<1x128xf32, #tpu.memory_space<vmem>>, %arg8: memref<1x128xf32, #tpu.memory_space<vmem>>, %arg9: memref<64x128xf32, #tpu.memory_space<vmem>>) attributes {dimension_semantics = [#tpu.dimension_semantics<parallel>], iteration_bounds = array<i64: 1>, scalar_prefetch = 0 : i64, scratch_operands = 0 : i64, tpu.core_type = #tpu.core_type<tc>, window_params = [{transform_indices = @transform_0, window_bounds = array<i64: 64, 128>}, {transform_indices = @transform_1, window_bounds = array<i64: 64, 128>}, {pipeline_mode = #tpu.pipeline_mode<synchronous>, transform_indices = @transform_2, window_bounds = array<i64: 128, 128>}, {pipeline_mode = #tpu.pipeline_mode<synchronous>, transform_indices = @transform_3, window_bounds = array<i64: 1, 128>}, {pipeline_mode = #tpu.pipeline_mode<synchronous>, transform_indices = @transform_4, window_bounds = array<i64: 128, 128>}, {pipeline_mode = #tpu.pipeline_mode<synchronous>, transform_indices = @transform_5, window_bounds = array<i64: 1, 128>}, {pipeline_mode = #tpu.pipeline_mode<synchronous>, transform_indices = @transform_6, window_bounds = array<i64: 1, 128>}, {pipeline_mode = #tpu.pipeline_mode<synchronous>, transform_indices = @transform_7, window_bounds = array<i64: 1, 128>}, {transform_indices = @transform_8, window_bounds = array<i64: 64, 128>}]} {
    %c0 = arith.constant 0 : index
    %c0_0 = arith.constant 0 : index
    %0 = vector.load %arg1[%c0, %c0_0] : memref<64x128xf32, #tpu.memory_space<vmem>>, vector<64x128xf32>
    %c0_1 = arith.constant 0 : index
    %c0_2 = arith.constant 0 : index
    %1 = vector.load %arg3[%c0_1, %c0_2] : memref<128x128xf32, #tpu.memory_space<vmem>>, vector<128x128xf32>
    %cst = arith.constant dense<0.000000e+00> : vector<64x128xf32>
    %2 = tpu.matmul %0, %1, %cst {dimension_numbers = #tpu.dot_dimension_numbers<[1], [1], [0], [0], [0, 0, 1, 0], [], []>} : vector<64x128xf32>, vector<128x128xf32>, vector<64x128xf32> -> vector<64x128xf32>
    %c0_3 = arith.constant 0 : index
    %c0_4 = arith.constant 0 : index
    %3 = vector.load %arg4[%c0_3, %c0_4] : memref<1x128xf32, #tpu.memory_space<vmem>>, vector<1x128xf32>
    %4 = vector.broadcast %3 : vector<1x128xf32> to vector<64x128xf32>
    %5 = arith.addf %2, %4 : vector<64x128xf32>
    %c0_5 = arith.constant 0 : index
    %c0_6 = arith.constant 0 : index
    %6 = vector.load %arg2[%c0_5, %c0_6] : memref<64x128xf32, #tpu.memory_space<vmem>>, vector<64x128xf32>
    %7 = arith.mulf %5, %6 : vector<64x128xf32>
    %8 = arith.negf %7 : vector<64x128xf32>
    %9 = math.exp %8 : vector<64x128xf32>
    %cst_7 = arith.constant 1.000000e+00 : f32
    %10 = vector.broadcast %cst_7 : f32 to vector<64x128xf32>
    %11 = arith.addf %10, %9 : vector<64x128xf32>
    %12 = arith.divf %10, %11 : vector<64x128xf32>
    %13 = arith.mulf %7, %12 : vector<64x128xf32>
    %c0_8 = arith.constant 0 : index
    %c0_9 = arith.constant 0 : index
    %14 = vector.load %arg5[%c0_8, %c0_9] : memref<128x128xf32, #tpu.memory_space<vmem>>, vector<128x128xf32>
    %cst_10 = arith.constant dense<0.000000e+00> : vector<64x128xf32>
    %15 = tpu.matmul %13, %14, %cst_10 {dimension_numbers = #tpu.dot_dimension_numbers<[1], [1], [0], [0], [0, 0, 1, 0], [], []>} : vector<64x128xf32>, vector<128x128xf32>, vector<64x128xf32> -> vector<64x128xf32>
    %c0_11 = arith.constant 0 : index
    %c0_12 = arith.constant 0 : index
    %16 = vector.load %arg6[%c0_11, %c0_12] : memref<1x128xf32, #tpu.memory_space<vmem>>, vector<1x128xf32>
    %17 = vector.broadcast %16 : vector<1x128xf32> to vector<64x128xf32>
    %18 = arith.addf %15, %17 : vector<64x128xf32>
    %19 = arith.addf %18, %0 : vector<64x128xf32>
    %c0_13 = arith.constant 0 : index
    %c0_14 = arith.constant 0 : index
    %20 = vector.load %arg7[%c0_13, %c0_14] : memref<1x128xf32, #tpu.memory_space<vmem>>, vector<1x128xf32>
    %c0_15 = arith.constant 0 : index
    %c0_16 = arith.constant 0 : index
    %21 = vector.load %arg8[%c0_15, %c0_16] : memref<1x128xf32, #tpu.memory_space<vmem>>, vector<1x128xf32>
    %cst_17 = arith.constant dense<0.000000e+00> : vector<64xf32>
    %22 = vector.multi_reduction <add>, %19, %cst_17 [1] : vector<64x128xf32> to vector<64xf32>
    %23 = vector.shape_cast %22 : vector<64xf32> to vector<64x1xf32>
    %cst_18 = arith.constant 3.125000e-02 : f32
    %24 = vector.broadcast %cst_18 : f32 to vector<64x1xf32>
    %25 = arith.mulf %23, %24 : vector<64x1xf32>
    %26 = vector.broadcast %25 : vector<64x1xf32> to vector<64x128xf32>
    %27 = arith.subf %19, %26 : vector<64x128xf32>
    %28 = tpu.iota {dimensions = array<i32: 1>} : vector<64x128xi32>
    %c32_i32 = arith.constant 32 : i32
    %29 = vector.broadcast %c32_i32 : i32 to vector<64x128xi32>
    %30 = arith.cmpi slt, %28, %29 : vector<64x128xi32>
    %cst_19 = arith.constant 0.000000e+00 : f32
    %31 = vector.broadcast %cst_19 : f32 to vector<64x128xf32>
    %32 = arith.select %30, %27, %31 : vector<64x128xi1>, vector<64x128xf32>
    %33 = arith.mulf %32, %32 : vector<64x128xf32>
    %cst_20 = arith.constant dense<0.000000e+00> : vector<64xf32>
    %34 = vector.multi_reduction <add>, %33, %cst_20 [1] : vector<64x128xf32> to vector<64xf32>
    %35 = vector.shape_cast %34 : vector<64xf32> to vector<64x1xf32>
    %cst_21 = arith.constant 3.125000e-02 : f32
    %36 = vector.broadcast %cst_21 : f32 to vector<64x1xf32>
    %37 = arith.mulf %35, %36 : vector<64x1xf32>
    %cst_22 = arith.constant 9.99999974E-6 : f32
    %38 = vector.broadcast %cst_22 : f32 to vector<64x1xf32>
    %39 = arith.addf %37, %38 : vector<64x1xf32>
    %40 = math.rsqrt %39 : vector<64x1xf32>
    %41 = vector.broadcast %25 : vector<64x1xf32> to vector<64x128xf32>
    %42 = arith.subf %19, %41 : vector<64x128xf32>
    %43 = vector.broadcast %40 : vector<64x1xf32> to vector<64x128xf32>
    %44 = arith.mulf %42, %43 : vector<64x128xf32>
    %45 = vector.broadcast %20 : vector<1x128xf32> to vector<64x128xf32>
    %46 = arith.mulf %44, %45 : vector<64x128xf32>
    %47 = vector.broadcast %21 : vector<1x128xf32> to vector<64x128xf32>
    %48 = arith.addf %46, %47 : vector<64x128xf32>
    %c0_23 = arith.constant 0 : index
    %c0_24 = arith.constant 0 : index
    %49 = vector.load %arg9[%c0_23, %c0_24] : memref<64x128xf32, #tpu.memory_space<vmem>>, vector<64x128xf32>
    tpu.vector_store %arg9[%c0_23, %c0_24], %48 {strides = array<i32>} : memref<64x128xf32, #tpu.memory_space<vmem>>, vector<64x128xf32>,
    return
  }
  func.func @transform_0(%arg0: i32) -> (i32, i32) {
    %c0_i32 = arith.constant 0 : i32
    %c0_i32_0 = arith.constant 0 : i32
    return %arg0, %c0_i32 : i32, i32
  }
  func.func @transform_1(%arg0: i32) -> (i32, i32) {
    %c0_i32 = arith.constant 0 : i32
    %c0_i32_0 = arith.constant 0 : i32
    return %arg0, %c0_i32 : i32, i32
  }
  func.func @transform_2(%arg0: i32) -> (i32, i32) {
    %c0_i32 = arith.constant 0 : i32
    %c0_i32_0 = arith.constant 0 : i32
    %c0_i32_1 = arith.constant 0 : i32
    return %c0_i32, %c0_i32_0 : i32, i32
  }
  func.func @transform_3(%arg0: i32) -> (i32, i32) {
    %c0_i32 = arith.constant 0 : i32
    %c0_i32_0 = arith.constant 0 : i32
    %c0_i32_1 = arith.constant 0 : i32
    return %c0_i32, %c0_i32_0 : i32, i32
  }
  func.func @transform_4(%arg0: i32) -> (i32, i32) {
    %c0_i32 = arith.constant 0 : i32
    %c0_i32_0 = arith.constant 0 : i32
    %c0_i32_1 = arith.constant 0 : i32
    return %c0_i32, %c0_i32_0 : i32, i32
  }
  func.func @transform_5(%arg0: i32) -> (i32, i32) {
    %c0_i32 = arith.constant 0 : i32
    %c0_i32_0 = arith.constant 0 : i32
    %c0_i32_1 = arith.constant 0 : i32
    return %c0_i32, %c0_i32_0 : i32, i32
  }
  func.func @transform_6(%arg0: i32) -> (i32, i32) {
    %c0_i32 = arith.constant 0 : i32
    %c0_i32_0 = arith.constant 0 : i32
    %c0_i32_1 = arith.constant 0 : i32
    return %c0_i32, %c0_i32_0 : i32, i32
  }
  func.func @transform_7(%arg0: i32) -> (i32, i32) {
    %c0_i32 = arith.constant 0 : i32
    %c0_i32_0 = arith.constant 0 : i32
    %c0_i32_1 = arith.constant 0 : i32
    return %c0_i32, %c0_i32_0 : i32, i32
  }
  func.func @transform_8(%arg0: i32) -> (i32, i32) {
    %c0_i32 = arith.constant 0 : i32
    %c0_i32_0 = arith.constant 0 : i32
    return %arg0, %c0_i32 : i32, i32
  }
}

</mosaic_0001>

<bundles_post_ra>
// kernel: tpu_custom_call.1
= control target key start
LH: loop header
LB: loop body
LE: loop exit
PB: predicated region body
PF: predicated region fallthrough
CT: control target
= control target key end

     0   :  { %13 = vsyncpa [#allocation3], 0  ;;  %s1074_s0 = inlined_call_operand.hbm [shape: f32[64,128], index: 0, kind: input, shape index: {}]   ;;  %s1075_s1 = inlined_call_operand.hbm [shape: f32[64,128], index: 1, kind: input, shape index: {}]   ;;  %s1076_s2 = inlined_call_operand.hbm [shape: f32[128,128], index: 2, kind: input, shape index: {}]   ;;  %s1077_s3 = inlined_call_operand.vmem [shape: f32[1,128], index: 3, kind: input, shape index: {}]   ;;  %s1078_s4 = inlined_call_operand.hbm [shape: f32[128,128], index: 4, kind: input, shape index: {}]   ;;  %s1079_s5 = inlined_call_operand.vmem [shape: f32[1,128], index: 5, kind: input, shape index: {}]   ;;  %s1080_s6 = inlined_call_operand.vmem [shape: f32[1,128], index: 6, kind: input, shape index: {}]   ;;  %s1081_s7 = inlined_call_operand.vmem [shape: f32[1,128], index: 7, kind: input, shape index: {}]   ;;  %s1082_s8 = inlined_call_operand.hbm [shape: f32[64,128], index: 8, kind: output, shape index: {}]  }
   0x1   :  { %14 = vsyncpa [#allocation6], 0 }
   0x2   :  { %15 = vsyncpa [#allocation9], 0 }
   0x3   :  { %16 = vsyncpa [#allocation4], 0  ;;  %s896_s27 = smov [#allocation5]   ;;  %s897_s29 = smov [#allocation2]  }
   0x4   :  { %s34_s28 = sshll.u32 %s896_s27, 4  ;;  %s22_s30 = sshll.u32 %s897_s29, 4  ;;  %s35_s28 = int_to_ptr.vmem [resolvable:$true] %s34_s28  ;;  %s23_s30 = int_to_ptr.vmem [resolvable:$true] %s22_s30 }
   0x5   :  { %s796_s9 = scalar_lea.vmem %s35_s28, 1024  ;;  %p801_p1 = scmp.lt.s32.totalorder %s35_s28, %s35_s28 }
   0x6   :  { %p797_p0 = scmp.ne.s32.totalorder %s35_s28, %s796_s9  ;;  %p802_p2 = scmp.lt.s32.totalorder %s796_s9, %s796_s9 }
   0x8   :  { %p803_p3 = por %p802_p2, %p801_p1 }
   0xa   :  { %p804_p4 = pnand %p803_p3, %p797_p0 }
   0xc   :  { %807 = shalt.err (!%p804_p4)
}
   0xd   :  { %s898_s10 = smov 128   ;;  %s899_s11 = smov 8  }
   0xe   :  { %40 = dma.hbm_to_vmem [thread:$0]  %s1075_s1, 1024, %s35_s28, [#allocation6], %s898_s10, %s898_s10, %s899_s11  }
   0xf   :  { %s816_s14 = scalar_lea.vmem %s23_s30, 1024  ;;  %p821_p6 = scmp.lt.s32.totalorder %s23_s30, %s23_s30 }
  0x10   :  { %p817_p5 = scmp.ne.s32.totalorder %s23_s30, %s816_s14  ;;  %p822_p7 = scmp.lt.s32.totalorder %s816_s14, %s816_s14 }
  0x12   :  { %p823_p8 = por %p822_p7, %p821_p6 }
  0x14   :  { %p824_p9 = pnand %p823_p8, %p817_p5 }
  0x16   :  { %827 = shalt.err (!%p824_p9)
}
  0x17   :  { %28 = dma.hbm_to_vmem [thread:$0]  %s1074_s0, 1024, %s23_s30, [#allocation3], %s898_s10, %s898_s10, %s899_s11  }
  0x18   :  { %s900_s17 = smov [#allocation7]   ;;  %s901_s19 = smov [#allocation8]  }
  0x19   :  { %s46_s18 = sshll.u32 %s900_s17, 4  ;;  %s60_s20 = sshll.u32 %s901_s19, 4  ;;  %s47_s18 = int_to_ptr.vmem [resolvable:$true] %s46_s18  ;;  %s61_s20 = int_to_ptr.vmem [resolvable:$true] %s60_s20 }
  0x1a   :  { %s836_s1 = scalar_lea.vmem %s47_s18, 2048  ;;  %p841_p11 = scmp.lt.s32.totalorder %s47_s18, %s47_s18 }
  0x1b   :  { %p837_p10 = scmp.ne.s32.totalorder %s47_s18, %s836_s1  ;;  %p842_p12 = scmp.lt.s32.totalorder %s836_s1, %s836_s1 }
  0x1d   :  { %p843_p13 = por %p842_p12, %p841_p11 }
  0x1f   :  { %p844_p0 = pnand %p843_p13, %p837_p10 }
  0x21   :  { %847 = shalt.err (!%p844_p0)
}
  0x22   :  { %52 = dma.hbm_to_vmem [thread:$0]  %s1076_s2, 2048, %s47_s18, [#allocation6], %s898_s10, %s898_s10, %s899_s11  }
  0x23   :  { %s856_s0 = scalar_lea.vmem %s61_s20, 2048  ;;  %p861_p2 = scmp.lt.s32.totalorder %s61_s20, %s61_s20 }
  0x24   :  { %p857_p1 = scmp.ne.s32.totalorder %s61_s20, %s856_s0  ;;  %p862_p3 = scmp.lt.s32.totalorder %s856_s0, %s856_s0 }
  0x26   :  { %p863_p4 = por %p862_p3, %p861_p2 }
  0x28   :  { %p864_p5 = pnand %p863_p4, %p857_p1 }
  0x2a   :  { %867 = shalt.err (!%p864_p5)
}
  0x2b   :  { %66 = dma.hbm_to_vmem [thread:$0]  %s1078_s4, 2048, %s61_s20, [#allocation9], %s898_s10, %s898_s10, %s899_s11  }
  0x2c   :  { %888 = dma.done.wait [#allocation3], 1024  }
  0x2d   :  { %889 = vsyncadd [#allocation3], 4294966272 }
  0x2e   :  { %890 = dma.done.wait [#allocation6], 3072  }
  0x2f   :  { %891 = vsyncadd [#allocation6], 4294964224 }
  0x30   :  { %892 = dma.done.wait [#allocation9], 2048  }
  0x31   :  { %893 = vsyncadd [#allocation9], 4294965248  ;;  %v108_v0 = vld [vmem:[#allocation7 + $0x78] sm:$0xff]  ;;  %v107_v1 = vld [vmem:[#allocation7 + $0x70] sm:$0xff] }
  0x32   :  { %645 = vmatprep.subr.mxu0 %v108_v0  ;;  %v106_v2 = vld [vmem:[#allocation7 + $0x68] sm:$0xff]  ;;  %v972_v3 = vld [vmem:[#allocation2] sm:$0xff]  ;;  %v308_v5 = vld [vmem:[#allocation8 + $0x78] sm:$0xff] }
  0x33   :  { %646 = vmatpush3.xpose.msra.mxu0 %v108_v0  ;;  %677 = vmatprep.mubr.f32.mxu0 %v972_v3  ;;  %v105_v4 = vld [vmem:[#allocation7 + $0x60] sm:$0xff]  ;;  %v307_v6 = vld [vmem:[#allocation8 + $0x70] sm:$0xff]  ;;  %v104_v7 = vld [vmem:[#allocation7 + $0x58] sm:$0xff] }
  0x34   :  { %647 = vmatprep.subr.mxu0 %v107_v1  ;;  %689 = vmatprep.subr.mxu1 %v308_v5  ;;  %v306_v8 = vld [vmem:[#allocation8 + $0x68] sm:$0xff]  ;;  %v103_v9 = vld [vmem:[#allocation7 + $0x50] sm:$0xff]  ;;  %v305_v10 = vld [vmem:[#allocation8 + $0x60] sm:$0xff] }
  0x35   :  { %690 = vmatpush3.xpose.msra.mxu1 %v308_v5  ;;  %v102_v11 = vld [vmem:[#allocation7 + $0x48] sm:$0xff]  ;;  %v304_v12 = vld [vmem:[#allocation8 + $0x58] sm:$0xff]  ;;  %v101_v13 = vld [vmem:[#allocation7 + $0x40] sm:$0xff] }
  0x36   :  { %691 = vmatprep.subr.mxu1 %v307_v6  ;;  %v303_v14 = vld [vmem:[#allocation8 + $0x50] sm:$0xff]  ;;  %v100_v15 = vld [vmem:[#allocation7 + $0x38] sm:$0xff]  ;;  %v98_v17 = vld [vmem:[#allocation7 + $0x28] sm:$0xff] }
  0x37   :  { %648 = vmatpush3.xpose.msra.mxu0 %v107_v1  ;;  %v99_v16 = vld [vmem:[#allocation7 + $0x30] sm:$0xff]  ;;  %v97_v18 = vld [vmem:[#allocation7 + $0x20] sm:$0xff]  ;;  %v96_v19 = vld [vmem:[#allocation7 + $0x18] sm:$0xff] }
  0x38   :  { %649 = vmatprep.subr.mxu0 %v106_v2  ;;  %v95_v20 = vld [vmem:[#allocation7 + $0x10] sm:$0xff]  ;;  %v94_v21 = vld [vmem:[#allocation7 + $0x8] sm:$0xff]  ;;  %v93_v22 = vld [vmem:[#allocation7] sm:$0xff] }
  0x39   :  { %692 = vmatpush3.xpose.msra.mxu1 %v307_v6  ;;  %v975_v23 = vld [vmem:[#allocation2 + $0x8] sm:$0xff]  ;;  %v977_v24 = vld [vmem:[#allocation2 + $0x10] sm:$0xff]  ;;  %v981_v25 = vld [vmem:[#allocation2 + $0x18] sm:$0xff] }
  0x3a   :  { %693 = vmatprep.subr.mxu1 %v306_v8  ;;  %v983_v26 = vld [vmem:[#allocation2 + $0x20] sm:$0xff]  ;;  %v987_v27 = vld [vmem:[#allocation2 + $0x28] sm:$0xff]  ;;  %v989_v28 = vld [vmem:[#allocation2 + $0x30] sm:$0xff] }
  0x3b   :  { %650 = vmatpush3.xpose.msra.mxu0 %v106_v2  ;;  %v993_v29 = vld [vmem:[#allocation2 + $0x38] sm:$0xff]  ;;  %v302_v30 = vld [vmem:[#allocation8 + $0x48] sm:$0xff]  ;;  %v301_v31 = vld [vmem:[#allocation8 + $0x40] sm:$0xff] }
  0x3c   :  { %651 = vmatprep.subr.mxu0 %v105_v4  ;;  %v300_v32 = vld [vmem:[#allocation8 + $0x38] sm:$0xff]  ;;  %v299_v33 = vld [vmem:[#allocation8 + $0x30] sm:$0xff]  ;;  %v298_v34 = vld [vmem:[#allocation8 + $0x28] sm:$0xff] }
  0x3d   :  { %694 = vmatpush3.xpose.msra.mxu1 %v306_v8  ;;  %v297_v35 = vld [vmem:[#allocation8 + $0x20] sm:$0xff]  ;;  %v296_v36 = vld [vmem:[#allocation8 + $0x18] sm:$0xff]  ;;  %v295_v37 = vld [vmem:[#allocation8 + $0x10] sm:$0xff] }
  0x3e   :  { %695 = vmatprep.subr.mxu1 %v305_v10  ;;  %v294_v38 = vld [vmem:[#allocation8 + $0x8] sm:$0xff]  ;;  %v293_v39 = vld [vmem:[#allocation8] sm:$0xff]  ;;  %v224_v49 = vld [vmem:[#allocation5 + $0x18] sm:$0xff] }
  0x3f   :  { %652 = vmatpush3.xpose.msra.mxu0 %v105_v4  ;;  %v585_v40 = vld [vmem:[%s1077_s3] ss:$0 sm:$0xff]  ;;  %v222_v42 = vld [vmem:[#allocation5 + $0x8] sm:$0xff]  ;;  %v223_v54 = vld [vmem:[#allocation5 + $0x10] sm:$0xff] }
  0x40   :  { %653 = vmatprep.subr.mxu0 %v104_v7  ;;  %v221_v45 = vld [vmem:[#allocation5] sm:$0xff]  ;;  %v226_v59 = vld [vmem:[#allocation5 + $0x28] sm:$0xff]  ;;  %v228_v6 = vld [vmem:[#allocation5 + $0x38] sm:$0xff] }
  0x41   :  { %696 = vmatpush3.xpose.msra.mxu1 %v305_v10  ;;  %v225_v0 = vld [vmem:[#allocation5 + $0x20] sm:$0xff] }
  0x42   :  { %697 = vmatprep.subr.mxu1 %v304_v12 }
  0x43   :  { %654 = vmatpush3.xpose.msra.mxu0 %v104_v7 }
  0x44   :  { %655 = vmatprep.subr.mxu0 %v103_v9 }
  0x45   :  { %698 = vmatpush3.xpose.msra.mxu1 %v304_v12 }
  0x46   :  { %699 = vmatprep.subr.mxu1 %v303_v14 }
  0x47   :  { %656 = vmatpush3.xpose.msra.mxu0 %v103_v9 }
  0x48   :  { %657 = vmatprep.subr.mxu0 %v102_v11 }
  0x49   :  { %700 = vmatpush3.xpose.msra.mxu1 %v303_v14 }
  0x4a   :  { %701 = vmatprep.subr.mxu1 %v302_v30 }
  0x4b   :  { %658 = vmatpush3.xpose.msra.mxu0 %v102_v11  ;;  %v227_v11 = vld [vmem:[#allocation5 + $0x30] sm:$0xff] }
  0x4c   :  { %659 = vmatprep.subr.mxu0 %v101_v13 }
  0x4d   :  { %702 = vmatpush3.xpose.msra.mxu1 %v302_v30 }
  0x4e   :  { %703 = vmatprep.subr.mxu1 %v301_v31 }
  0x4f   :  { %660 = vmatpush3.xpose.msra.mxu0 %v101_v13 }
  0x50   :  { %661 = vmatprep.subr.mxu0 %v100_v15 }
  0x51   :  { %704 = vmatpush3.xpose.msra.mxu1 %v301_v31 }
  0x52   :  { %705 = vmatprep.subr.mxu1 %v300_v32 }
  0x53   :  { %662 = vmatpush3.xpose.msra.mxu0 %v100_v15 }
  0x54   :  { %663 = vmatprep.subr.mxu0 %v99_v16 }
  0x55   :  { %706 = vmatpush3.xpose.msra.mxu1 %v300_v32 }
  0x56   :  { %707 = vmatprep.subr.mxu1 %v299_v33 }
  0x57   :  { %664 = vmatpush3.xpose.msra.mxu0 %v99_v16 }
  0x58   :  { %665 = vmatprep.subr.mxu0 %v98_v17 }
  0x59   :  { %708 = vmatpush3.xpose.msra.mxu1 %v299_v33 }
  0x5a   :  { %709 = vmatprep.subr.mxu1 %v298_v34 }
  0x5b   :  { %666 = vmatpush3.xpose.msra.mxu0 %v98_v17 }
  0x5c   :  { %667 = vmatprep.subr.mxu0 %v97_v18 }
  0x5d   :  { %710 = vmatpush3.xpose.msra.mxu1 %v298_v34 }
  0x5e   :  { %711 = vmatprep.subr.mxu1 %v297_v35 }
  0x5f   :  { %668 = vmatpush3.xpose.msra.mxu0 %v97_v18 }
  0x60   :  { %669 = vmatprep.subr.mxu0 %v96_v19 }
  0x61   :  { %712 = vmatpush3.xpose.msra.mxu1 %v297_v35 }
  0x62   :  { %713 = vmatprep.subr.mxu1 %v296_v36 }
  0x63   :  { %670 = vmatpush3.xpose.msra.mxu0 %v96_v19 }
  0x64   :  { %671 = vmatprep.subr.mxu0 %v95_v20 }
  0x65   :  { %714 = vmatpush3.xpose.msra.mxu1 %v296_v36 }
  0x66   :  { %715 = vmatprep.subr.mxu1 %v295_v37 }
  0x67   :  { %672 = vmatpush3.xpose.msra.mxu0 %v95_v20 }
  0x68   :  { %673 = vmatprep.subr.mxu0 %v94_v21 }
  0x69   :  { %716 = vmatpush3.xpose.msra.mxu1 %v295_v37 }
  0x6a   :  { %717 = vmatprep.subr.mxu1 %v294_v38 }
  0x6b   :  { %674 = vmatpush3.xpose.msra.mxu0 %v94_v21 }
  0x6c   :  { %675 = vmatprep.subr.mxu0 %v93_v22 }
  0x6d   :  { %718 = vmatpush3.xpose.msra.mxu1 %v294_v38 }
  0x6e   :  { %719 = vmatprep.subr.mxu1 %v293_v39 }
  0x6f   :  { %676 = vmatpush3.xpose.msra.mxu0 %v93_v22 }
  0x71   :  { %720 = vmatpush3.xpose.msra.mxu1 %v293_v39 }
  0x72   :  { %678 = vmatmul.mubr.f32.vlgmr.msra.gmra.mxu0 %v975_v23 }
  0x73   :  { %680 = vmatprep.mubr.f32.mxu0 %v977_v24 }
  0x76   :  { %681 = vmatmul.mubr.f32.gmra.mxu0 %v981_v25 }
  0x77   :  { %683 = vmatprep.mubr.f32.mxu0 %v983_v26 }
  0x7a   :  { %684 = vmatmul.mubr.f32.gmra.mxu0 %v987_v27 }
  0x7b   :  { %686 = vmatprep.mubr.f32.mxu0 %v989_v28 }
  0x7e   :  { %687 = vmatmul.mubr.f32.gmra.mxu0 %v993_v29 }
 0x132   :  { %v679_v41 = vpop.f32.mrf.mxu0 }
 0x133   :  { %v188_v43 = vadd.f32 %v679_v41, %v585_v40 }
 0x134   :  { %v182_v44 = vpop.f32.mrf.mxu0 }
 0x135   :  { %v999_v46 = vmul.f32 %v222_v42, %v188_v43  ;;  %v183_v47 = vadd.f32 %v585_v40, %v182_v44 }
 0x136   :  { %v682_v48 = vpop.f32.mrf.mxu0 }
 0x137   :  { %v587_v50 = vmul.f32 -1.442695, %v999_v46  ;;  %v198_v51 = vadd.f32 %v682_v48, %v585_v40  ;;  %v1002_v52 = vmul.f32 %v221_v45, %v183_v47 }
 0x138   :  { %v192_v53 = vpop.f32.mrf.mxu0 }
 0x139   :  { %740 = vpow2.f32 %v587_v50  ;;  %v1004_v55 = vmul.f32 %v224_v49, %v198_v51  ;;  %v193_v56 = vadd.f32 %v585_v40, %v192_v53  ;;  %v586_v57 = vmul.f32 -1.442695, %v1002_v52 }
 0x13a   :  { %v685_v58 = vpop.f32.mrf.mxu0 }
 0x13b   :  { %v589_v60 = vmul.f32 -1.442695, %v1004_v55  ;;  %v231_v61 = vmul.f32 %v223_v54, %v193_v56  ;;  %v208_v62 = vadd.f32 %v685_v58, %v585_v40  ;;  %742 = vpow2.f32 %v586_v57 }
 0x13c   :  { %v202_v63 = vpop.f32.mrf.mxu0 }
 0x13d   :  { %744 = vpow2.f32 %v589_v60  ;;  %v588_v1 = vmul.f32 -1.442695, %v231_v61  ;;  %v234_v2 = vmul.f32 %v226_v59, %v208_v62  ;;  %v203_v4 = vadd.f32 %v585_v40, %v202_v63 }
 0x13e   :  { %v688_v5 = vpop.f32.mrf.mxu0 }
 0x13f   :  { %746 = vpow2.f32 %v588_v1  ;;  %v591_v7 = vmul.f32 -1.442695, %v234_v2  ;;  %v233_v8 = vmul.f32 %v225_v0, %v203_v4  ;;  %v218_v9 = vadd.f32 %v688_v5, %v585_v40 }
 0x140   :  { %v212_v10 = vpop.f32.mrf.mxu0 }
 0x141   :  { %748 = vpow2.f32 %v591_v7  ;;  %v590_v12 = vmul.f32 -1.442695, %v233_v8  ;;  %v236_v13 = vmul.f32 %v228_v6, %v218_v9  ;;  %v213_v14 = vadd.f32 %v585_v40, %v212_v10 }
 0x143   :  { %750 = vpow2.f32 %v590_v12  ;;  %v593_v15 = vmul.f32 -1.442695, %v236_v13  ;;  %v235_v16 = vmul.f32 %v227_v11, %v213_v14 }
 0x145   :  { %752 = vpow2.f32 %v593_v15  ;;  %v592_v17 = vmul.f32 -1.442695, %v235_v16 }
 0x146   :  { %v741_v18 = vpop.eup %740 }
 0x147   :  { %v262_v19 = vadd.f32 1.0, %v741_v18  ;;  %754 = vpow2.f32 %v592_v17 }
 0x148   :  { %v743_v20 = vpop.eup %742 }
 0x149   :  { %v261_v21 = vadd.f32 1.0, %v743_v20  ;;  %756 = vrcp.f32 %v262_v19 }
 0x14a   :  { %v745_v22 = vpop.eup %744 }
 0x14b   :  { %v264_v30 = vadd.f32 1.0, %v745_v22  ;;  %758 = vrcp.f32 %v261_v21 }
 0x14c   :  { %v747_v31 = vpop.eup %746 }
 0x14d   :  { %v263_v32 = vadd.f32 1.0, %v747_v31  ;;  %760 = vrcp.f32 %v264_v30 }
 0x14e   :  { %v749_v33 = vpop.eup %748 }
 0x14f   :  { %762 = vrcp.f32 %v263_v32  ;;  %v266_v34 = vadd.f32 1.0, %v749_v33 }
 0x150   :  { %v751_v35 = vpop.eup %750 }
 0x151   :  { %v265_v36 = vadd.f32 1.0, %v751_v35  ;;  %764 = vrcp.f32 %v266_v34 }
 0x152   :  { %v753_v37 = vpop.eup %752 }
 0x153   :  { %766 = vrcp.f32 %v265_v36  ;;  %v268_v38 = vadd.f32 1.0, %v753_v37 }
 0x154   :  { %v755_v39 = vpop.eup %754 }
 0x155   :  { %v267_v40 = vadd.f32 1.0, %v755_v39  ;;  %768 = vrcp.f32 %v268_v38 }
 0x156   :  { %v757_v41 = vpop.eup %756 }
 0x157   :  { %770 = vrcp.f32 %v267_v40  ;;  %v286_v44 = vmul.f32 %v757_v41, %v999_v46  ;;  %v594_v46 = vld [vmem:[%s1079_s5] ss:$0 sm:$0xff] }
 0x158   :  { %v759_v42 = vpop.eup %758 }
 0x159   :  { %v285_v43 = vmul.f32 %v759_v42, %v1002_v52 }
 0x15a   :  { %v761_v45 = vpop.eup %760 }
 0x15b   :  { %721 = vmatprep.mubr.f32.mxu1 %v285_v43  ;;  %v288_v49 = vmul.f32 %v761_v45, %v1004_v55 }
 0x15c   :  { %v763_v47 = vpop.eup %762  ;;  %722 = vmatmul.mubr.f32.vlgmr.msra.gmra.mxu1 %v286_v44 }
 0x15d   :  { %v287_v48 = vmul.f32 %v763_v47, %v231_v61 }
 0x15e   :  { %v765_v50 = vpop.eup %764 }
 0x15f   :  { %724 = vmatprep.mubr.f32.mxu1 %v287_v48  ;;  %v290_v54 = vmul.f32 %v765_v50, %v234_v2 }
 0x160   :  { %v767_v51 = vpop.eup %766  ;;  %725 = vmatmul.mubr.f32.gmra.mxu1 %v288_v49 }
 0x161   :  { %v289_v53 = vmul.f32 %v767_v51, %v233_v8 }
 0x162   :  { %v769_v56 = vpop.eup %768 }
 0x163   :  { %727 = vmatprep.mubr.f32.mxu1 %v289_v53  ;;  %v292_v58 = vmul.f32 %v769_v56, %v236_v13 }
 0x164   :  { %v771_v57 = vpop.eup %770  ;;  %728 = vmatmul.mubr.f32.gmra.mxu1 %v290_v54 }
 0x165   :  { %v291_v52 = vmul.f32 %v771_v57, %v235_v16  ;;  %v463_v16 = vlaneseq }
 0x167   :  { %730 = vmatprep.mubr.f32.mxu1 %v291_v52  ;;  %v464_v17 = vand.u32 127, %v463_v16 }
 0x168   :  { %731 = vmatmul.mubr.f32.gmra.mxu1 %v292_v58 }
 0x169   :  { %vm465_vm0 = vcmp.lt.s32.totalorder %v464_v17, 32  ;;  %v595_v17 = vld [vmem:[%s1080_s6] ss:$0 sm:$0xff]  ;;  %s902_s6 = smov [#allocation10]  }
 0x21c   :  { %v723_v59 = vpop.f32.mrf.mxu1 }
 0x21d   :  { %v388_v55 = vadd.f32 %v723_v59, %v594_v46 }
 0x21e   :  { %v382_v60 = vpop.f32.mrf.mxu1 }
 0x21f   :  { %v383_v61 = vadd.f32 %v594_v46, %v382_v60  ;;  %v422_v62 = vadd.f32 %v388_v55, %v975_v23 }
 0x220   :  { %v726_v63 = vpop.f32.mrf.mxu1 }
 0x221   :  { %v398_v0 = vadd.f32 %v726_v63, %v594_v46  ;;  %433 = vadd.xlane.f32.xlu0 %v422_v62  ;;  %v421_v5 = vadd.f32 %v383_v61, %v972_v3 }
 0x222   :  { %v392_v1 = vpop.f32.mrf.mxu1 }
 0x223   :  { %v393_v2 = vadd.f32 %v594_v46, %v392_v1  ;;  %v424_v4 = vadd.f32 %v398_v0, %v981_v25 }
 0x224   :  { %v729_v6 = vpop.f32.mrf.mxu1 }
 0x225   :  { %437 = vadd.xlane.f32.xlu1 %v424_v4  ;;  %431 = vadd.xlane.f32.xlu0 %v421_v5  ;;  %v408_v8 = vadd.f32 %v729_v6, %v594_v46  ;;  %v423_v10 = vadd.f32 %v393_v2, %v977_v24 }
 0x226   :  { %v402_v7 = vpop.f32.mrf.mxu1 }
 0x227   :  { %v403_v9 = vadd.f32 %v594_v46, %v402_v7  ;;  %v426_v25 = vadd.f32 %v408_v8, %v987_v27 }
 0x228   :  { %v732_v11 = vpop.f32.mrf.mxu1 }
 0x229   :  { %435 = vadd.xlane.f32.xlu1 %v423_v10  ;;  %v425_v23 = vadd.f32 %v403_v9, %v983_v26  ;;  %v418_v13 = vadd.f32 %v732_v11, %v594_v46 }
 0x22a   :  { %v412_v12 = vpop.f32.mrf.mxu1 }
 0x22b   :  { %v413_v14 = vadd.f32 %v594_v46, %v412_v12  ;;  %439 = vadd.xlane.f32.xlu0 %v425_v23  ;;  %v428_v15 = vadd.f32 %v418_v13, %v993_v29 }
 0x22d   :  { %441 = vadd.xlane.f32.xlu1 %v426_v25  ;;  %v427_v3 = vadd.f32 %v413_v14, %v989_v28 }
 0x22f   :  { %443 = vadd.xlane.f32.xlu0 %v427_v3 }
 0x231   :  { %445 = vadd.xlane.f32.xlu1 %v428_v15 }
 0x2aa   :  { %v434_v24 = vpop.xlane.xlu0 %433 }
 0x2ab   :  { %v448_v18 = vmul.f32 0.03125, %v434_v24 }
 0x2ad   :  { %v1022_v19 = vsub.f32 %v422_v62, %v448_v18 }
 0x2ae   :  { %v438_v26 = vpop.xlane.xlu1 %437  ;;  %v432_v20 = vpop.xlane.xlu0 %431 }
 0x2af   :  { %v450_v21 = vmul.f32 0.03125, %v438_v26  ;;  %v447_v22 = vmul.f32 0.03125, %v432_v20  ;;  %v467_v27 = vsel %vm465_vm0, %v1022_v19, 0.0  ;;  %v596_v20 = vld [vmem:[%s1081_s7] ss:$0 sm:$0xff]  ;;  %s571_s7 = sshll.u32 %s902_s6, 4  ;;  %s572_s7 = int_to_ptr.vmem [resolvable:$true] %s571_s7 }
 0x2b0   :  { %v475_v30 = vmul.f32 %v467_v27, %v467_v27  ;;  %s868_s29 = scalar_lea.vmem %s572_s7, 1024  ;;  %p873_p7 = scmp.lt.s32.totalorder %s572_s7, %s572_s7 }
 0x2b1   :  { %v1026_v28 = vsub.f32 %v424_v4, %v450_v21  ;;  %v1028_v31 = vsub.f32 %v421_v5, %v447_v22  ;;  %p869_p6 = scmp.ne.s32.totalorder %s572_s7, %s868_s29  ;;  %p874_p8 = scmp.lt.s32.totalorder %s868_s29, %s868_s29 }
 0x2b2   :  { %484 = vadd.xlane.f32.xlu1 %v475_v30  ;;  %v436_v29 = vpop.xlane.xlu1 %435 }
 0x2b3   :  { %v449_v32 = vmul.f32 0.03125, %v436_v29  ;;  %v469_v33 = vsel %vm465_vm0, %v1026_v28, 0.0  ;;  %v466_v34 = vsel %vm465_vm0, %v1028_v31, 0.0  ;;  %p875_p9 = por %p874_p8, %p873_p7 }
 0x2b4   :  { %v440_v35 = vpop.xlane.xlu0 %439  ;;  %v477_v36 = vmul.f32 %v469_v33, %v469_v33  ;;  %v474_v37 = vmul.f32 %v466_v34, %v466_v34 }
 0x2b5   :  { %v1034_v38 = vsub.f32 %v423_v10, %v449_v32  ;;  %v451_v39 = vmul.f32 0.03125, %v440_v35  ;;  %p876_p10 = pnand %p875_p9, %p869_p6 }
 0x2b6   :  { %488 = vadd.xlane.f32.xlu1 %v477_v36  ;;  %v442_v40 = vpop.xlane.xlu1 %441  ;;  %482 = vadd.xlane.f32.xlu0 %v474_v37 }
 0x2b7   :  { %v1036_v41 = vsub.f32 %v425_v23, %v451_v39  ;;  %v452_v42 = vmul.f32 0.03125, %v442_v40  ;;  %v468_v43 = vsel %vm465_vm0, %v1034_v38, 0.0 }
 0x2b8   :  { %v444_v44 = vpop.xlane.xlu0 %443  ;;  %v476_v45 = vmul.f32 %v468_v43, %v468_v43 }
 0x2b9   :  { %v1040_v47 = vsub.f32 %v426_v25, %v452_v42  ;;  %v453_v48 = vmul.f32 0.03125, %v444_v44  ;;  %v470_v49 = vsel %vm465_vm0, %v1036_v41, 0.0 }
 0x2ba   :  { %v446_v50 = vpop.xlane.xlu1 %445  ;;  %486 = vadd.xlane.f32.xlu0 %v476_v45  ;;  %v478_v57 = vmul.f32 %v470_v49, %v470_v49 }
 0x2bb   :  { %v1044_v51 = vsub.f32 %v427_v3, %v453_v48  ;;  %v454_v53 = vmul.f32 0.03125, %v446_v50  ;;  %v471_v54 = vsel %vm465_vm0, %v1040_v47, 0.0 }
 0x2bc   :  { %v479_v56 = vmul.f32 %v471_v54, %v471_v54 }
 0x2bd   :  { %v1048_v52 = vsub.f32 %v428_v15, %v454_v53  ;;  %v472_v58 = vsel %vm465_vm0, %v1044_v51, 0.0 }
 0x2be   :  { %492 = vadd.xlane.f32.xlu1 %v479_v56  ;;  %490 = vadd.xlane.f32.xlu0 %v478_v57  ;;  %v480_v55 = vmul.f32 %v472_v58, %v472_v58 }
 0x2bf   :  { %v473_v46 = vsel %vm465_vm0, %v1048_v52, 0.0 }
 0x2c0   :  { %v481_v59 = vmul.f32 %v473_v46, %v473_v46 }
 0x2c2   :  { %496 = vadd.xlane.f32.xlu1 %v481_v59  ;;  %494 = vadd.xlane.f32.xlu0 %v480_v55 }
 0x33b   :  { %v485_v60 = vpop.xlane.xlu1 %484 }
 0x33c   :  { %v499_v61 = vmul.f32 0.03125, %v485_v60 }
 0x33e   :  { %v507_v62 = vadd.f32 1e-05, %v499_v61 }
 0x33f   :  { %v489_v63 = vpop.xlane.xlu1 %488  ;;  %v483_v0 = vpop.xlane.xlu0 %482 }
 0x340   :  { %772 = vrsqrt.f32 %v507_v62  ;;  %v501_v1 = vmul.f32 0.03125, %v489_v63  ;;  %v498_v2 = vmul.f32 0.03125, %v483_v0 }
 0x342   :  { %v509_v4 = vadd.f32 1e-05, %v501_v1  ;;  %v506_v5 = vadd.f32 1e-05, %v498_v2 }
 0x343   :  { %v487_v6 = vpop.xlane.xlu0 %486 }
 0x344   :  { %774 = vrsqrt.f32 %v509_v4  ;;  %v500_v7 = vmul.f32 0.03125, %v487_v6 }
 0x345   :  { %776 = vrsqrt.f32 %v506_v5 }
 0x346   :  { %v508_v8 = vadd.f32 1e-05, %v500_v7 }
 0x347   :  { %v493_v9 = vpop.xlane.xlu1 %492  ;;  %v491_v10 = vpop.xlane.xlu0 %490 }
 0x348   :  { %778 = vrsqrt.f32 %v508_v8  ;;  %v503_v11 = vmul.f32 0.03125, %v493_v9  ;;  %v502_v23 = vmul.f32 0.03125, %v491_v10 }
 0x34a   :  { %v511_v12 = vadd.f32 1e-05, %v503_v11  ;;  %v510_v13 = vadd.f32 1e-05, %v502_v23 }
 0x34b   :  { %v497_v14 = vpop.xlane.xlu1 %496  ;;  %v495_v25 = vpop.xlane.xlu0 %494 }
 0x34c   :  { %780 = vrsqrt.f32 %v511_v12  ;;  %v505_v3 = vmul.f32 0.03125, %v497_v14  ;;  %v504_v15 = vmul.f32 0.03125, %v495_v25 }
 0x34d   :  { %v773_v16 = vpop.eup %772  ;;  %782 = vrsqrt.f32 %v510_v13 }
 0x34e   :  { %v523_v24 = vmul.f32 %v773_v16, %v1022_v19  ;;  %v513_v18 = vadd.f32 1e-05, %v505_v3  ;;  %v512_v26 = vadd.f32 1e-05, %v504_v15 }
 0x350   :  { %v537_v21 = vmul.f32 %v595_v17, %v523_v24  ;;  %784 = vrsqrt.f32 %v513_v18 }
 0x351   :  { %v775_v22 = vpop.eup %774  ;;  %786 = vrsqrt.f32 %v512_v26 }
 0x352   :  { %v777_v27 = vpop.eup %776  ;;  %v551_v30 = vadd.f32 %v596_v20, %v537_v21  ;;  %v525_v29 = vmul.f32 %v775_v22, %v1026_v28 }
 0x353   :  { %v522_v32 = vmul.f32 %v777_v27, %v1028_v31 }
 0x354   :  { %559 = vst [vmem:[#allocation10 + $0x8] sm:$0xff] %v551_v30  ;;  %v539_v33 = vmul.f32 %v595_v17, %v525_v29 }
 0x355   :  { %v779_v34 = vpop.eup %778  ;;  %v536_v19 = vmul.f32 %v595_v17, %v522_v32 }
 0x356   :  { %v553_v35 = vadd.f32 %v596_v20, %v539_v33  ;;  %v524_v36 = vmul.f32 %v779_v34, %v1034_v38 }
 0x357   :  { %v550_v37 = vadd.f32 %v596_v20, %v536_v19 }
 0x358   :  { %561 = vst [vmem:[#allocation10 + $0x18] sm:$0xff] %v553_v35  ;;  %v538_v39 = vmul.f32 %v595_v17, %v524_v36 }
 0x359   :  { %v781_v40 = vpop.eup %780  ;;  %558 = vst [vmem:[#allocation10] sm:$0xff] %v550_v37 }
 0x35a   :  { %v783_v42 = vpop.eup %782  ;;  %v552_v43 = vadd.f32 %v596_v20, %v538_v39  ;;  %v527_v44 = vmul.f32 %v781_v40, %v1040_v47 }
 0x35b   :  { %v526_v28 = vmul.f32 %v783_v42, %v1036_v41 }
 0x35c   :  { %560 = vst [vmem:[#allocation10 + $0x10] sm:$0xff] %v552_v43  ;;  %v541_v31 = vmul.f32 %v595_v17, %v527_v44 }
 0x35d   :  { %v785_v45 = vpop.eup %784  ;;  %v540_v48 = vmul.f32 %v595_v17, %v526_v28 }
 0x35e   :  { %v787_v49 = vpop.eup %786  ;;  %v555_v50 = vadd.f32 %v596_v20, %v541_v31  ;;  %v529_v53 = vmul.f32 %v785_v45, %v1048_v52 }
 0x35f   :  { %v554_v38 = vadd.f32 %v596_v20, %v540_v48  ;;  %v528_v54 = vmul.f32 %v787_v49, %v1044_v51 }
 0x360   :  { %563 = vst [vmem:[#allocation10 + $0x28] sm:$0xff] %v555_v50  ;;  %v543_v56 = vmul.f32 %v595_v17, %v529_v53 }
 0x361   :  { %562 = vst [vmem:[#allocation10 + $0x20] sm:$0xff] %v554_v38  ;;  %v542_v57 = vmul.f32 %v595_v17, %v528_v54 }
 0x362   :  { %v557_v47 = vadd.f32 %v596_v20, %v543_v56 }
 0x363   :  { %v556_v58 = vadd.f32 %v596_v20, %v542_v57 }
 0x364   :  { %565 = vst [vmem:[#allocation10 + $0x38] sm:$0xff] %v557_v47 }
 0x365   :  { %564 = vst [vmem:[#allocation10 + $0x30] sm:$0xff] %v556_v58 }
 0x366   :  { %879 = shalt.err (!%p876_p10)
}
 0x367   :  { %577 = dma.vmem_to_hbm [thread:$0]  %s572_s7, 1024, %s1082_s8, [#allocation4], %s898_s10, %s898_s10, %s899_s11  }
 0x368   :  { %894 = dma.done.wait [#allocation4], 1024  }
 0x369   :  { %895 = vsyncadd [#allocation4], 4294966272 }
 0x36a   :  { %581 = vsyncpa [#allocation3], 1 }
 0x36b   :  { %582 = vsyncpa [#allocation6], 1 }
 0x36c   :  { %583 = vsyncpa [#allocation9], 1 }
 0x36d   :  { %584 = vsyncpa [#allocation4], 1 }

</bundles_post_ra>
